<compile_context>
chip_gen: v5e
topology: v5e:2x2
jax: 0.10.0
libtpu: 0.0.40
codegen_flags: <defaults>
</compile_context>

<pallas_src>
import functools
import math

import jax
import jax.numpy as jnp
from jax.experimental import pallas as pl
from jax.experimental.pallas import tpu as pltpu

_VMEM_LIMIT = 64 * 1024 * 1024   # raise scoped VMEM limit (16/32 MiB defaults on v5e/v6e)
_ROW_TILE_CAP = 256              # keep double-buffered row tiles inside v7x's 64 MiB VMEM


def _round_up(x, m):
    return ((x + m - 1) // m) * m


def _compiler_params():
    return pltpu.CompilerParams(
        dimension_semantics=("parallel",),
        vmem_limit_bytes=_VMEM_LIMIT,
    )


def _row_tiling(m):
    """Row-tile size (multiple of 8, <= cap) and padded row count (multiple of tile)."""
    tile = min(_ROW_TILE_CAP, _round_up(m, 8))
    return tile, _round_up(m, tile)


def _pad_rows(x, padded):
    m = x.shape[0]
    if padded == m:
        return x
    return jnp.pad(x, ((0, padded - m), (0, 0)))


# ---------------------------------------------------------------------------
# Kernels
# ---------------------------------------------------------------------------
def _qkv_kernel(x_ref, w_ref, b_ref, o_ref):
    """o = x @ [Wq|Wk|Wv] + b  (fused QKV projection, lane-dense 3*D output)."""
    y = jnp.dot(x_ref[...], w_ref[...], preferred_element_type=jnp.float32)
    o_ref[...] = (y + b_ref[...]).astype(o_ref.dtype)


def _attention_kernel(qkv_ref, o_ref, w_ref, *, nhead, d_k, scale):
    """Per-batch multi-head attention core.

    Reads q/k/v directly from the fused (S, 3*D) qkv tile via static column
    offsets (no wrapper-side split/transpose). Per-head 2-D MXU dots; the head
    outputs are concatenated so the attention output is one lane-dense (S, D)
    store with heads folded onto the lane axis.
    """
    d_model = nhead * d_k
    qkv = qkv_ref[...]
    inv_scale = 1.0 / scale
    outs = []
    for h in range(nhead):           # static unroll over heads
        q = qkv[:, h * d_k:(h + 1) * d_k] * inv_scale
        k = qkv[:, d_model + h * d_k:d_model + (h + 1) * d_k]
        v = qkv[:, 2 * d_model + h * d_k:2 * d_model + (h + 1) * d_k]
        s = jnp.einsum("qd,kd->qk", q, k, preferred_element_type=jnp.float32)
        # TODO(synk): src_mask support omitted -- default / demo path uses src_mask=None.
        m = jnp.max(s, axis=-1, keepdims=True)
        e = jnp.exp(s - m)
        p = e * pl.reciprocal(jnp.sum(e, axis=-1, keepdims=True), approx=True)
        w_ref[0, h] = p.astype(w_ref.dtype)
        outs.append(jnp.dot(p, v, preferred_element_type=jnp.float32))
    o_ref[...] = jnp.concatenate(outs, axis=-1).astype(o_ref.dtype)


def _proj_add_ln_kernel(x_ref, res_ref, w_ref, b_ref, g_ref, beta_ref, o_ref, *, eps):
    """o = LayerNorm(res + x @ W_o + b_o)  (projection + residual + LN1 fused)."""
    y = jnp.dot(x_ref[...], w_ref[...], preferred_element_type=jnp.float32)
    z = y + b_ref[...] + res_ref[...].astype(jnp.float32)
    mu = jnp.mean(z, axis=-1, keepdims=True)
    d = z - mu
    var = jnp.mean(d * d, axis=-1, keepdims=True)
    o_ref[...] = (d * jax.lax.rsqrt(var + eps) * g_ref[...] + beta_ref[...]).astype(o_ref.dtype)


def _ffn_add_ln_kernel(x_ref, w1_ref, b1_ref, w2_ref, b2_ref, g_ref, beta_ref, o_ref, *, eps):
    """o = LayerNorm(x + relu(x @ W1 + b1) @ W2 + b2)  (whole FFN + residual + LN2;
    the (rows, DFF) intermediate never leaves VMEM)."""
    x = x_ref[...]
    h = jnp.dot(x, w1_ref[...], preferred_element_type=jnp.float32) + b1_ref[...]
    h = jnp.maximum(h, 0.0)
    y = jnp.dot(h, w2_ref[...], preferred_element_type=jnp.float32) + b2_ref[...]
    z = y + x.astype(jnp.float32)
    mu = jnp.mean(z, axis=-1, keepdims=True)
    d = z - mu
    var = jnp.mean(d * d, axis=-1, keepdims=True)
    o_ref[...] = (d * jax.lax.rsqrt(var + eps) * g_ref[...] + beta_ref[...]).astype(o_ref.dtype)


# ---------------------------------------------------------------------------
# Wrappers
# ---------------------------------------------------------------------------
def _qkv_proj(x2d, w, b):
    m, k = x2d.shape
    n = w.shape[1]
    tm, mp = _row_tiling(m)
    cost = pl.CostEstimate(flops=2 * mp * k * n, transcendentals=0,
                           bytes_accessed=4 * (mp * k + k * n + mp * n))
    out = pl.pallas_call(
        _qkv_kernel,
        out_shape=jax.ShapeDtypeStruct((mp, n), x2d.dtype),
        grid=(mp // tm,),
        in_specs=[
            pl.BlockSpec((tm, k), lambda i: (i, 0)),
            pl.BlockSpec((k, n), lambda i: (0, 0)),   # weight resident across row tiles
            pl.BlockSpec((1, n), lambda i: (0, 0)),
        ],
        out_specs=pl.BlockSpec((tm, n), lambda i: (i, 0)),
        compiler_params=_compiler_params(),
        cost_estimate=cost,
    )(_pad_rows(x2d, mp), w, b.reshape(1, n))
    return out[:m]


def _attention(qkv2d, bsz, seq, nhead, d_k, scale):
    d_model = nhead * d_k
    cost = pl.CostEstimate(
        flops=4 * bsz * nhead * seq * seq * d_k,
        transcendentals=bsz * nhead * seq * seq,
        bytes_accessed=4 * (bsz * seq * 3 * d_model + bsz * seq * d_model
                            + bsz * nhead * seq * seq),
    )
    return pl.pallas_call(
        functools.partial(_attention_kernel, nhead=nhead, d_k=d_k, scale=scale),
        out_shape=(jax.ShapeDtypeStruct((bsz * seq, d_model), qkv2d.dtype),
                   jax.ShapeDtypeStruct((bsz, nhead, seq, seq), jnp.float32)),
        grid=(bsz,),
        in_specs=[pl.BlockSpec((seq, 3 * d_model), lambda b: (b, 0))],
        out_specs=(pl.BlockSpec((seq, d_model), lambda b: (b, 0)),
                   pl.BlockSpec((1, nhead, seq, seq), lambda b: (b, 0, 0, 0))),
        compiler_params=_compiler_params(),
        cost_estimate=cost,
    )(qkv2d)


def _proj_add_ln(x2d, res2d, w, b, gamma, beta, eps=1e-5):
    m, k = x2d.shape
    n = w.shape[1]
    tm, mp = _row_tiling(m)
    vec = lambda v: v.reshape(1, -1)
    cost = pl.CostEstimate(flops=2 * mp * k * n + 10 * mp * n, transcendentals=mp,
                           bytes_accessed=4 * (mp * k + k * n + 2 * mp * n))
    out = pl.pallas_call(
        functools.partial(_proj_add_ln_kernel, eps=eps),
        out_shape=jax.ShapeDtypeStruct((mp, n), x2d.dtype),
        grid=(mp // tm,),
        in_specs=[
            pl.BlockSpec((tm, k), lambda i: (i, 0)),
            pl.BlockSpec((tm, n), lambda i: (i, 0)),
            pl.BlockSpec((k, n), lambda i: (0, 0)),
            pl.BlockSpec((1, n), lambda i: (0, 0)),
            pl.BlockSpec((1, n), lambda i: (0, 0)),
            pl.BlockSpec((1, n), lambda i: (0, 0)),
        ],
        out_specs=pl.BlockSpec((tm, n), lambda i: (i, 0)),
        compiler_params=_compiler_params(),
        cost_estimate=cost,
    )(_pad_rows(x2d, mp), _pad_rows(res2d, mp), w, vec(b), vec(gamma), vec(beta))
    return out[:m]


def _ffn_add_ln(x2d, w1, b1, w2, b2, gamma, beta, eps=1e-5):
    m, d = x2d.shape
    dff = w1.shape[1]
    tm, mp = _row_tiling(m)
    vec = lambda v: v.reshape(1, -1)
    cost = pl.CostEstimate(flops=4 * mp * d * dff + 10 * mp * d, transcendentals=mp,
                           bytes_accessed=4 * (2 * mp * d + 2 * d * dff))
    out = pl.pallas_call(
        functools.partial(_ffn_add_ln_kernel, eps=eps),
        out_shape=jax.ShapeDtypeStruct((mp, d), x2d.dtype),
        grid=(mp // tm,),
        in_specs=[
            pl.BlockSpec((tm, d), lambda i: (i, 0)),
            pl.BlockSpec((d, dff), lambda i: (0, 0)),
            pl.BlockSpec((1, dff), lambda i: (0, 0)),
            pl.BlockSpec((dff, d), lambda i: (0, 0)),
            pl.BlockSpec((1, d), lambda i: (0, 0)),
            pl.BlockSpec((1, d), lambda i: (0, 0)),
            pl.BlockSpec((1, d), lambda i: (0, 0)),
        ],
        out_specs=pl.BlockSpec((tm, d), lambda i: (i, 0)),
        compiler_params=_compiler_params(),
        cost_estimate=cost,
    )(_pad_rows(x2d, mp), w1, vec(b1), w2, vec(b2), vec(gamma), vec(beta))
    return out[:m]


def transformer_encoder_layer(src, params, nhead):
    """src: (B, S, D)  ->  (out (B, S, D), attn_weights (B, nhead, S, S))."""
    bsz, seq, d_model = src.shape
    d_k = d_model // nhead
    scale = math.sqrt(d_k)
    x2d = src.reshape(bsz * seq, d_model)

    # ---- Multi-head self-attention --------------------------------------
    qkv = _qkv_proj(x2d, params["w_qkv"], params["b_qkv"])         # (B*S, 3D)
    attn_out, attn_w = _attention(qkv, bsz, seq, nhead, d_k, scale)
    # TODO(synk): dropout / dropout1 / dropout2 are identity (eval-mode inference).
    h1 = _proj_add_ln(attn_out, x2d, params["w_o"], params["b_o"],
                      params["ln1_g"], params["ln1_b"])            # W_o + residual + LN1

    # ---- Feed-forward (fully fused) --------------------------------------
    out = _ffn_add_ln(h1, params["w1"], params["b1"], params["w2"], params["b2"],
                      params["ln2_g"], params["ln2_b"])            # W1+ReLU+W2 + residual + LN2

    return out.reshape(bsz, seq, d_model), attn_w


# ---------------------------------------------------------------------------
# Pure-JAX reference (same math, same weights) for correctness checking
# ---------------------------------------------------------------------------
def _reference(src, params, nhead):
    bsz, seq, d_model = src.shape
    d_k = d_model // nhead
    scale = math.sqrt(d_k)
    x = src.reshape(bsz * seq, d_model)

    qkv = jnp.dot(x, params["w_qkv"]) + params["b_qkv"]
    q, k, v = jnp.split(qkv, 3, axis=-1)

    def heads(t):
        return t.reshape(bsz, seq, nhead, d_k).transpose(0, 2, 1, 3)

    q, k, v = heads(q), heads(k), heads(v)
    s = jnp.einsum("bhqd,bhkd->bhqk", q, k) / scale
    w = jax.nn.softmax(s, axis=-1)
    a = jnp.einsum("bhqk,bhkd->bhqd", w, v)
    a = a.transpose(0, 2, 1, 3).reshape(bsz * seq, d_model)
    src2 = jnp.dot(a, params["w_o"]) + params["b_o"]

    def ln(z, g, b, eps=1e-5):
        mu = z.mean(-1, keepdims=True)
        var = ((z - mu) ** 2).mean(-1, keepdims=True)
        return (z - mu) * jax.lax.rsqrt(var + eps) * g + b

    h1 = ln(x + src2, params["ln1_g"], params["ln1_b"])
    ff = jnp.maximum(jnp.dot(h1, params["w1"]) + params["b1"], 0.0)
    ff = jnp.dot(ff, params["w2"]) + params["b2"]
    out = ln(h1 + ff, params["ln2_g"], params["ln2_b"])
    return out.reshape(bsz, seq, d_model), w


if __name__ == "__main__":
    # Small demo shapes consistent with the module: batch=2, seq=8, d_model=32, nhead=4.
    B, S, D, H, DFF = 2, 8, 32, 4, 64

    key = jax.random.PRNGKey(0)
    ks = jax.random.split(key, 13)

    def init(k, shape, scl):
        return scl * jax.random.normal(k, shape, dtype=jnp.float32)

    params = {
        "w_qkv": init(ks[0], (D, 3 * D), 1.0 / math.sqrt(D)),
        "b_qkv": init(ks[1], (3 * D,), 0.02),
        "w_o":   init(ks[2], (D, D),   1.0 / math.sqrt(D)),
        "b_o":   init(ks[3], (D,),     0.02),
        "w1":    init(ks[4], (D, DFF), 1.0 / math.sqrt(D)),
        "b1":    init(ks[5], (DFF,),   0.02),
        "w2":    init(ks[6], (DFF, D), 1.0 / math.sqrt(DFF)),
        "b2":    init(ks[7], (D,),     0.02),
        "ln1_g": 1.0 + init(ks[8], (D,), 0.05),
        "ln1_b": init(ks[9], (D,), 0.05),
        "ln2_g": 1.0 + init(ks[10], (D,), 0.05),
        "ln2_b": init(ks[11], (D,), 0.05),
    }
    src = jax.random.normal(ks[12], (B, S, D), dtype=jnp.float32)

    out, attn_w = transformer_encoder_layer(src, params, nhead=H)
    out = jax.block_until_ready(out)
    attn_w = jax.block_until_ready(attn_w)

    ref_out, ref_w = _reference(src, params, nhead=H)

    assert out.shape == (B, S, D)
    assert attn_w.shape == (B, H, S, S)
    # Default MXU precision (not HIGHEST) -> looser tolerances vs the f32 reference.
    assert jnp.allclose(out, ref_out, atol=5e-2, rtol=5e-2), (
        "output mismatch, max abs err = %e" % float(jnp.max(jnp.abs(out - ref_out))))
    assert jnp.allclose(attn_w, ref_w, atol=2e-2, rtol=2e-2), (
        "attn weights mismatch, max abs err = %e" % float(jnp.max(jnp.abs(attn_w - ref_w))))

    print("KERNEL_OK")
</pallas_src>

<mosaic_0001>
module attributes {stable_mosaic.version = 11 : i64} {
  func.func @_qkv_kernel(%arg0: i32, %arg1: memref<16x32xf32, #tpu.memory_space<vmem>>, %arg2: memref<32x96xf32, #tpu.memory_space<vmem>>, %arg3: memref<1x96xf32, #tpu.memory_space<vmem>>, %arg4: memref<16x96xf32, #tpu.memory_space<vmem>>) attributes {dimension_semantics = [#tpu.dimension_semantics<parallel>], iteration_bounds = array<i64: 1>, scalar_prefetch = 0 : i64, scratch_operands = 0 : i64, tpu.core_type = #tpu.core_type<tc>, window_params = [{transform_indices = @transform_0, window_bounds = array<i64: 16, 32>}, {pipeline_mode = #tpu.pipeline_mode<synchronous>, transform_indices = @transform_1, window_bounds = array<i64: 32, 96>}, {pipeline_mode = #tpu.pipeline_mode<synchronous>, transform_indices = @transform_2, window_bounds = array<i64: 1, 96>}, {transform_indices = @transform_3, window_bounds = array<i64: 16, 96>}]} {
    %c0 = arith.constant 0 : index
    %c0_0 = arith.constant 0 : index
    %0 = vector.load %arg1[%c0, %c0_0] : memref<16x32xf32, #tpu.memory_space<vmem>>, vector<16x32xf32>
    %c0_1 = arith.constant 0 : index
    %c0_2 = arith.constant 0 : index
    %1 = vector.load %arg2[%c0_1, %c0_2] : memref<32x96xf32, #tpu.memory_space<vmem>>, vector<32x96xf32>
    %cst = arith.constant dense<0.000000e+00> : vector<16x96xf32>
    %2 = tpu.matmul %0, %1, %cst {dimension_numbers = #tpu.dot_dimension_numbers<[1], [0], [0], [1], [0, 0, 1, 1], [], []>} : vector<16x32xf32>, vector<32x96xf32>, vector<16x96xf32> -> vector<16x96xf32>
    %c0_3 = arith.constant 0 : index
    %c0_4 = arith.constant 0 : index
    %3 = vector.load %arg3[%c0_3, %c0_4] : memref<1x96xf32, #tpu.memory_space<vmem>>, vector<1x96xf32>
    %4 = vector.broadcast %3 : vector<1x96xf32> to vector<16x96xf32>
    %5 = arith.addf %2, %4 : vector<16x96xf32>
    %c0_5 = arith.constant 0 : index
    %c0_6 = arith.constant 0 : index
    %6 = vector.load %arg4[%c0_5, %c0_6] : memref<16x96xf32, #tpu.memory_space<vmem>>, vector<16x96xf32>
    tpu.vector_store %arg4[%c0_5, %c0_6], %5 {strides = array<i32>} : memref<16x96xf32, #tpu.memory_space<vmem>>, vector<16x96xf32>,
    return
  }
  func.func @transform_0(%arg0: i32) -> (i32, i32) {
    %c0_i32 = arith.constant 0 : i32
    %c0_i32_0 = arith.constant 0 : i32
    return %arg0, %c0_i32 : i32, i32
  }
  func.func @transform_1(%arg0: i32) -> (i32, i32) {
    %c0_i32 = arith.constant 0 : i32
    %c0_i32_0 = arith.constant 0 : i32
    %c0_i32_1 = arith.constant 0 : i32
    return %c0_i32, %c0_i32_0 : i32, i32
  }
  func.func @transform_2(%arg0: i32) -> (i32, i32) {
    %c0_i32 = arith.constant 0 : i32
    %c0_i32_0 = arith.constant 0 : i32
    %c0_i32_1 = arith.constant 0 : i32
    return %c0_i32, %c0_i32_0 : i32, i32
  }
  func.func @transform_3(%arg0: i32) -> (i32, i32) {
    %c0_i32 = arith.constant 0 : i32
    %c0_i32_0 = arith.constant 0 : i32
    return %arg0, %c0_i32 : i32, i32
  }
}

</mosaic_0001>

<bundles_post_ra>
// kernel: tpu_custom_call.1
= control target key start
LH: loop header
LB: loop body
LE: loop exit
PB: predicated region body
PF: predicated region fallthrough
CT: control target
= control target key end

     0   :  { %8 = vsyncpa [#allocation3], 0  ;;  %s246_s0 = inlined_call_operand.hbm [shape: f32[16,32], index: 0, kind: input, shape index: {}]   ;;  %s247_s1 = inlined_call_operand.hbm [shape: f32[32,96], index: 1, kind: input, shape index: {}]   ;;  %s248_s2 = inlined_call_operand.vmem [shape: f32[1,96], index: 2, kind: input, shape index: {}]   ;;  %s249_s3 = inlined_call_operand.hbm [shape: f32[16,96], index: 3, kind: output, shape index: {}]  }
   0x1   :  { %9 = vsyncpa [#allocation6], 0 }
   0x2   :  { %10 = vsyncpa [#allocation4], 0  ;;  %s15_s14 = sshll.u32 %s246_s0, 4  ;;  %s200_s15 = smov [#allocation2]   ;;  %s16_s14 = int_to_ptr.hbm [resolvable:$true] %s15_s14 }
   0x3   :  { %s17_s16 = sshll.u32 %s200_s15, 4  ;;  %s28_s19 = sshll.u32 %s247_s1, 4  ;;  %s18_s16 = int_to_ptr.vmem [resolvable:$true] %s17_s16  ;;  %s29_s19 = int_to_ptr.hbm [resolvable:$true] %s28_s19 }
   0x4   :  { %s201_s20 = smov 128   ;;  %s202_s21 = smov 8  }
   0x5   :  { %23 = dma.hbm_to_vmem [thread:$0]  %s16_s14, 256, %s18_s16, [#allocation3], %s201_s20, %s201_s20, %s202_s21  }
   0x6   :  { %s203_s22 = smov [#allocation5]  }
   0x7   :  { %s30_s23 = sshll.u32 %s203_s22, 4  ;;  %s31_s23 = int_to_ptr.vmem [resolvable:$true] %s30_s23 }
   0x8   :  { %36 = dma.hbm_to_vmem [thread:$0]  %s29_s19, 512, %s31_s23, [#allocation6], %s201_s20, %s201_s20, %s202_s21  }
   0x9   :  { %194 = dma.done.wait [#allocation3], 256  }
   0xa   :  { %195 = vsyncadd [#allocation3], 4294967040 }
   0xb   :  { %196 = dma.done.wait [#allocation6], 512  }
   0xc   :  { %197 = vsyncadd [#allocation6], 4294966784  ;;  %v52_v0 = vld [vmem:[#allocation5 + $0x18] sm:$0xff]  ;;  %v51_v1 = vld [vmem:[#allocation5 + $0x10] sm:$0xff]  ;;  %vm57_vm0 = vcmask 261120   ;;  %s204_s24 = smov [#allocation7]  }
   0xd   :  { %76 = vmatpush.msra.mxu0 %v52_v0  ;;  %112 = vmatpush.msra.mxu1 %v52_v0  ;;  %v50_v2 = vld [vmem:[#allocation5 + $0x8] sm:$0xff]  ;;  %v49_v3 = vld [vmem:[#allocation5] sm:$0xff]  ;;  %v47_v4 = vld [vmem:[#allocation2] sm:$0xff]  ;;  %s94_s25 = sshll.u32 %s204_s24, 4  ;;  %s96_s28 = sshll.u32 %s249_s3, 4  ;;  %vm87_vm1 = vcmask 785408   ;;  %s95_s25 = int_to_ptr.vmem [resolvable:$true] %s94_s25  ;;  %s97_s28 = int_to_ptr.hbm [resolvable:$true] %s96_s28 }
   0xe   :  { %v48_v5 = vld [vmem:[#allocation2 + $0x8] sm:$0xff]  ;;  %v121_v6 = vld [vmem:[%s248_s2] ss:$0 sm:$0xff] }
   0xf   :  { %77 = vmatpush.msra.mxu0 %v51_v1  ;;  %113 = vmatpush.msra.mxu1 %v51_v1 }
  0x11   :  { %78 = vmatpush.msra.mxu0 %v50_v2  ;;  %114 = vmatpush.msra.mxu1 %v50_v2 }
  0x13   :  { %79 = vmatpush.msra.mxu0 %v49_v3  ;;  %115 = vmatpush.msra.mxu1 %v49_v3 }
  0x14   :  { %110 = vmatmul.msk.f32.vlgmr.msra.gmra.mxu0 %vm57_vm0, %v47_v4  ;;  %111 = vmatmul.msk.f32.vlgmr.msra.gmra.mxu1 %vm57_vm0, %v48_v5 }
  0x91   :  { %v81_v7 = vpop.f32.mrf.mxu0  ;;  %v84_v8 = vpop.f32.mrf.mxu1 }
  0x92   :  { %v82_v9 = vadd.f32 %v121_v6, %v81_v7  ;;  %v85_v10 = vadd.f32 %v121_v6, %v84_v8 }
  0x94   :  { %88 = vst.msk [vmem:[#allocation7] sm:$0xff] %vm87_vm1, %v82_v9 }
  0x95   :  { %89 = vst.msk [vmem:[#allocation7 + $0x8] sm:$0xff] %vm87_vm1, %v85_v10 }
  0x96   :  { %102 = dma.vmem_to_hbm [thread:$0]  %s95_s25, 256, %s97_s28, [#allocation4], %s201_s20, %s201_s20, %s202_s21  }
  0x97   :  { %198 = dma.done.wait [#allocation4], 256  }
  0x98   :  { %199 = vsyncadd [#allocation4], 4294967040 }
  0x99   :  { %107 = vsyncpa [#allocation3], 1 }
  0x9a   :  { %108 = vsyncpa [#allocation6], 1 }
  0x9b   :  { %109 = vsyncpa [#allocation4], 1 }

</bundles_post_ra>
